<compile_context>
chip_gen: v5e
topology: v5e:2x2
jax: 0.10.0
libtpu: 0.0.40
codegen_flags: <defaults>
</compile_context>

<pallas_src>
import numpy as np
import jax
import jax.numpy as jnp
from jax.experimental import pallas as pl
from jax.experimental.pallas import tpu as pltpu

BN_EPS = 1e-5

# Sublane-aligned row offsets of the sections inside the packed weight slab.
_W1_R0, _W2_R0, _FC1_R0, _HEAD_R0, _W_ROWS = 0, 24, 96, 112, 176


def _build_im2col_idx():
    """conv1 im2col gather: row = oh*5+ow (4x5 output), col = c*9+kh*3+kw,
    value = flat index into the (2, 6, 7) board (C-order)."""
    idx = np.zeros((20, 18), np.int32)
    for oh in range(4):
        for ow in range(5):
            for c in range(2):
                for kh in range(3):
                    for kw in range(3):
                        idx[oh * 5 + ow, c * 9 + kh * 3 + kw] = (
                            c * 42 + (oh + kh) * 7 + (ow + kw))
    return idx


_IM2COL_IDX = _build_im2col_idx()


def actor_critic_kernel(xcol_ref, w_ref, p_ref, out_ref):
    xcol = xcol_ref[0]                                               # (20, 18)

    # ---- conv1 (im2col matmul) + bias + ReLU ---------------------- (20, 8)
    y1 = jnp.dot(xcol, w_ref[_W1_R0:_W1_R0 + 18, 0:8],
                 preferred_element_type=jnp.float32)
    y1 = jnp.maximum(y1 + p_ref[0:1, 0:8], 0.0)

    # ---- bn1: training-mode batch stats over the 20 spatial positions
    mu1 = jnp.mean(y1, axis=0, keepdims=True)
    var1 = jnp.mean((y1 - mu1) ** 2, axis=0, keepdims=True)
    y1 = ((y1 - mu1) * jax.lax.rsqrt(var1 + BN_EPS) * p_ref[1:2, 0:8]
          + p_ref[2:3, 0:8])                                         # (20, 8) value

    # ---- conv2: 3x3 valid conv over the (4, 5, 8) activation -> (2, 3, 12)
    # Nine (8,8)@(8,12) dots into ONE accumulator.  Row r of `acc` is the
    # conv2 output at spatial offset r of the 4x5 map (r in {0,1,2} -> output
    # row 0, r in {5,6,7} -> output row 1); rows 3,4 are unused wrap positions.
    acc = jnp.zeros((8, 12), jnp.float32)
    for kh in range(3):
        for kw in range(3):
            k = kh * 3 + kw
            base = kh * 5 + kw
            acc = acc + jnp.dot(
                y1[base:base + 8, :],
                w_ref[_W2_R0 + k * 8:_W2_R0 + (k + 1) * 8, 0:12],
                preferred_element_type=jnp.float32)
    z2 = jnp.maximum(acc + p_ref[3:4, 0:12], 0.0)                    # (8, 12)

    # ---- bn2: batch stats over the 6 real spatial positions (mask rows 3,4)
    rows = jax.lax.broadcasted_iota(jnp.int32, (8, 1), 0)
    valid = jnp.logical_or(rows < 3, rows > 4)
    mu2 = jnp.sum(jnp.where(valid, z2, 0.0), axis=0, keepdims=True) / 6.0
    dev = jnp.where(valid, z2 - mu2, 0.0)
    var2 = jnp.sum(dev * dev, axis=0, keepdims=True) / 6.0
    z2 = ((z2 - mu2) * jax.lax.rsqrt(var2 + BN_EPS) * p_ref[4:5, 0:12]
          + p_ref[5:6, 0:12])

    # ---- maxpool 2x2 stride 2 on the (2, 3) map: positions (0,0),(0,1),
    #      (1,0),(1,1) -> accumulator rows 0, 1, 5, 6 ------------------ (1, 12)
    pooled = jnp.maximum(jnp.maximum(z2[0:1, :], z2[1:2, :]),
                         jnp.maximum(z2[5:6, :], z2[6:7, :]))

    # ---- fc1 + ReLU ------------------------------------------------ (1, 64)
    h = jnp.dot(pooled, w_ref[_FC1_R0:_FC1_R0 + 12, 0:64],
                preferred_element_type=jnp.float32) + p_ref[6:7, 0:64]
    h = jnp.maximum(h, 0.0)

    # ---- fused actor + critic head: one (1,64)@(64,8) dot ----------- (1, 8)
    head = (jnp.dot(h, w_ref[_HEAD_R0:_HEAD_R0 + 64, 0:8],
                    preferred_element_type=jnp.float32) + p_ref[7:8, 0:8])
    lane = jax.lax.broadcasted_iota(jnp.int32, (1, 8), 1)
    is_logit = lane < 7
    z = jnp.where(is_logit, head, -1e30)                 # lane 7 = critic value
    z = z - jnp.max(z, axis=-1, keepdims=True)
    e = jnp.exp(z)
    probs8 = e / jnp.sum(e, axis=-1, keepdims=True)      # softmax over 7 actions
    out_ref[...] = jnp.where(is_logit, probs8, head)[None]   # (1,1,8): probs|value

    # TODO(synk): Categorical sampling / Adam update / replay buffers
    # (select_action, finish_episode, save/load) are host-side RL bookkeeping,
    # not part of the forward kernel.


def pack_params(p):
    """One-time packing (hoisted out of the step loop): all matmul weights into
    a single lane-padded slab, all 1-D parameters into one (8,128) row block."""
    w1col = jnp.transpose(p["w1"], (1, 2, 3, 0)).reshape(18, 8)      # (c,kh,kw) x out
    w2col = jnp.transpose(p["w2"], (2, 3, 1, 0)).reshape(72, 12)     # (kh,kw,c) x out
    wfc1 = p["wfc1"].T                                               # (12, 64)
    whead = jnp.concatenate([p["wact"].T, p["wcrit"].T], axis=1)     # (64, 8)

    wslab = jnp.zeros((_W_ROWS, 128), jnp.float32)
    wslab = wslab.at[_W1_R0:_W1_R0 + 18, 0:8].set(w1col)
    wslab = wslab.at[_W2_R0:_W2_R0 + 72, 0:12].set(w2col)
    wslab = wslab.at[_FC1_R0:_FC1_R0 + 12, 0:64].set(wfc1)
    wslab = wslab.at[_HEAD_R0:_HEAD_R0 + 64, 0:8].set(whead)

    pvec = jnp.zeros((8, 128), jnp.float32)
    pvec = pvec.at[0, 0:8].set(p["b1"])
    pvec = pvec.at[1, 0:8].set(p["g1"])
    pvec = pvec.at[2, 0:8].set(p["bt1"])
    pvec = pvec.at[3, 0:12].set(p["b2"])
    pvec = pvec.at[4, 0:12].set(p["g2"])
    pvec = pvec.at[5, 0:12].set(p["bt2"])
    pvec = pvec.at[6, 0:64].set(p["bfc1"])
    pvec = pvec.at[7, 0:8].set(jnp.concatenate([p["bact"], p["bcrit"]]))
    return wslab, pvec


@jax.jit
def actor_critic_forward(x, wslab, pvec):
    """x: (B, 2, 6, 7) float32 boards. Each board is processed independently
    (per-board BN batch stats), i.e. the PyTorch forward run once per board.
    Returns (probs (B, 7), value (B, 1))."""
    b_sz = x.shape[0]
    idx = jnp.asarray(_IM2COL_IDX.reshape(-1))
    xcol = x.reshape(b_sz, 84)[:, idx].reshape(b_sz, 20, 18)         # one gather

    out = pl.pallas_call(
        actor_critic_kernel,
        out_shape=jax.ShapeDtypeStruct((b_sz, 1, 8), jnp.float32),
        grid=(b_sz,),
        in_specs=[
            pl.BlockSpec((1, 20, 18), lambda b: (b, 0, 0)),
            pl.BlockSpec((_W_ROWS, 128), lambda b: (0, 0)),   # resident across grid
            pl.BlockSpec((8, 128), lambda b: (0, 0)),         # resident across grid
        ],
        out_specs=pl.BlockSpec((1, 1, 8), lambda b: (b, 0, 0)),
        compiler_params=pltpu.CompilerParams(
            dimension_semantics=("parallel",)),
    )(xcol, wslab, pvec)

    out = out[:, 0, :]
    return out[:, 0:7], out[:, 7:8]


def reference_forward(x_chw, p):
    """Pure-JAX reference (lax.conv), NCHW, matching the PyTorch forward (train mode)."""
    dn = ("NCHW", "OIHW", "NCHW")
    y = jax.lax.conv_general_dilated(x_chw[None], p["w1"], (1, 1), "VALID",
                                     dimension_numbers=dn)
    y = jnp.maximum(y + p["b1"][None, :, None, None], 0.0)
    mu = y.mean(axis=(0, 2, 3), keepdims=True)
    var = ((y - mu) ** 2).mean(axis=(0, 2, 3), keepdims=True)
    y = ((y - mu) * jax.lax.rsqrt(var + BN_EPS) * p["g1"][None, :, None, None]
         + p["bt1"][None, :, None, None])
    y = jax.lax.conv_general_dilated(y, p["w2"], (1, 1), "VALID", dimension_numbers=dn)
    y = jnp.maximum(y + p["b2"][None, :, None, None], 0.0)
    mu = y.mean(axis=(0, 2, 3), keepdims=True)
    var = ((y - mu) ** 2).mean(axis=(0, 2, 3), keepdims=True)
    y = ((y - mu) * jax.lax.rsqrt(var + BN_EPS) * p["g2"][None, :, None, None]
         + p["bt2"][None, :, None, None])
    y = y[:, :, 0:2, 0:2].max(axis=(2, 3))                           # maxpool 2x2 -> (1, 12)
    h = jnp.maximum(y @ p["wfc1"].T + p["bfc1"], 0.0)
    probs = jax.nn.softmax(h @ p["wact"].T + p["bact"], axis=-1)
    value = h @ p["wcrit"].T + p["bcrit"]
    return probs, value


def init_params(key):
    ks = jax.random.split(key, 14)
    def nrm(k, shape, scale):
        return scale * jax.random.normal(k, shape, jnp.float32)
    return {
        "w1": nrm(ks[0], (8, 2, 3, 3), (2.0 * 9) ** -0.5),
        "b1": nrm(ks[1], (8,), 0.1),
        "g1": 1.0 + 0.1 * jax.random.normal(ks[2], (8,), jnp.float32),
        "bt1": nrm(ks[3], (8,), 0.1),
        "w2": nrm(ks[4], (12, 8, 3, 3), (8.0 * 9) ** -0.5),
        "b2": nrm(ks[5], (12,), 0.1),
        "g2": 1.0 + 0.1 * jax.random.normal(ks[6], (12,), jnp.float32),
        "bt2": nrm(ks[7], (12,), 0.1),
        "wfc1": nrm(ks[8], (64, 12), 12.0 ** -0.5),
        "bfc1": nrm(ks[9], (64,), 0.1),
        "wact": nrm(ks[10], (7, 64), 64.0 ** -0.5),
        "bact": nrm(ks[11], (7,), 0.1),
        "wcrit": nrm(ks[12], (1, 64), 64.0 ** -0.5),
        "bcrit": nrm(ks[13], (1,), 0.1),
    }


if __name__ == "__main__":
    key = jax.random.PRNGKey(0)
    kx, kp = jax.random.split(key)
    B = 4
    # Connect-4 observations: B boards of 2 planes x 6 x 7 (CHW layout).
    x = jax.random.normal(kx, (B, 2, 6, 7), jnp.float32)
    params = init_params(kp)

    wslab, pvec = pack_params(params)            # hoisted: once per weight set

    probs, value = jax.block_until_ready(actor_critic_forward(x, wslab, pvec))

    ref_p, ref_v = jax.vmap(reference_forward, in_axes=(0, None))(x, params)
    ref_p = jnp.asarray(ref_p).reshape(B, 7)
    ref_v = jnp.asarray(ref_v).reshape(B, 1)

    assert probs.shape == (B, 7) and value.shape == (B, 1)
    assert jnp.allclose(jnp.sum(probs, axis=-1), 1.0, atol=1e-4)
    assert jnp.allclose(probs, ref_p, atol=2e-3, rtol=2e-3)
    assert jnp.allclose(value, ref_v, atol=2e-3, rtol=2e-3)
    print("KERNEL_OK")
</pallas_src>

<mosaic_0001>
module attributes {stable_mosaic.version = 11 : i64} {
  func.func @actor_critic_kernel(%arg0: i32, %arg1: memref<1x20x18xf32, #tpu.memory_space<vmem>>, %arg2: memref<176x128xf32, #tpu.memory_space<vmem>>, %arg3: memref<8x128xf32, #tpu.memory_space<vmem>>, %arg4: memref<1x1x8xf32, #tpu.memory_space<vmem>>) attributes {dimension_semantics = [#tpu.dimension_semantics<parallel>], iteration_bounds = array<i64: 4>, scalar_prefetch = 0 : i64, scratch_operands = 0 : i64, tpu.core_type = #tpu.core_type<tc>, window_params = [{transform_indices = @transform_0, window_bounds = array<i64: 1, 20, 18>}, {pipeline_mode = #tpu.pipeline_mode<synchronous>, transform_indices = @transform_1, window_bounds = array<i64: 176, 128>}, {pipeline_mode = #tpu.pipeline_mode<synchronous>, transform_indices = @transform_2, window_bounds = array<i64: 8, 128>}, {transform_indices = @transform_3, window_bounds = array<i64: 1, 1, 8>}]} {
    %c0 = arith.constant 0 : index
    %c0_0 = arith.constant 0 : index
    %c0_1 = arith.constant 0 : index
    %0 = vector.load %arg1[%c0, %c0_0, %c0_1] : memref<1x20x18xf32, #tpu.memory_space<vmem>>, vector<1x20x18xf32>
    %1 = vector.shape_cast %0 : vector<1x20x18xf32> to vector<20x18xf32>
    %c0_2 = arith.constant 0 : index
    %c0_3 = arith.constant 0 : index
    %2 = vector.load %arg2[%c0_2, %c0_3] : memref<176x128xf32, #tpu.memory_space<vmem>>, vector<18x8xf32>
    %cst = arith.constant dense<0.000000e+00> : vector<20x8xf32>
    %3 = tpu.matmul %1, %2, %cst {dimension_numbers = #tpu.dot_dimension_numbers<[1], [0], [0], [1], [0, 0, 1, 1], [], []>} : vector<20x18xf32>, vector<18x8xf32>, vector<20x8xf32> -> vector<20x8xf32>
    %c0_4 = arith.constant 0 : index
    %c0_5 = arith.constant 0 : index
    %4 = vector.load %arg3[%c0_4, %c0_5] : memref<8x128xf32, #tpu.memory_space<vmem>>, vector<1x8xf32>
    %5 = vector.broadcast %4 : vector<1x8xf32> to vector<20x8xf32>
    %6 = arith.addf %3, %5 : vector<20x8xf32>
    %cst_6 = arith.constant 0.000000e+00 : f32
    %7 = vector.broadcast %cst_6 : f32 to vector<20x8xf32>
    %8 = arith.maximumf %6, %7 : vector<20x8xf32>
    %cst_7 = arith.constant dense<0.000000e+00> : vector<8xf32>
    %9 = vector.multi_reduction <add>, %8, %cst_7 [0] : vector<20x8xf32> to vector<8xf32>
    %10 = vector.shape_cast %9 : vector<8xf32> to vector<1x8xf32>
    %cst_8 = arith.constant 2.000000e+01 : f32
    %11 = vector.broadcast %cst_8 : f32 to vector<1x8xf32>
    %12 = arith.divf %10, %11 : vector<1x8xf32>
    %13 = vector.broadcast %12 : vector<1x8xf32> to vector<20x8xf32>
    %14 = arith.subf %8, %13 : vector<20x8xf32>
    %15 = arith.mulf %14, %14 : vector<20x8xf32>
    %cst_9 = arith.constant dense<0.000000e+00> : vector<8xf32>
    %16 = vector.multi_reduction <add>, %15, %cst_9 [0] : vector<20x8xf32> to vector<8xf32>
    %17 = vector.shape_cast %16 : vector<8xf32> to vector<1x8xf32>
    %cst_10 = arith.constant 2.000000e+01 : f32
    %18 = vector.broadcast %cst_10 : f32 to vector<1x8xf32>
    %19 = arith.divf %17, %18 : vector<1x8xf32>
    %20 = vector.broadcast %12 : vector<1x8xf32> to vector<20x8xf32>
    %21 = arith.subf %8, %20 : vector<20x8xf32>
    %cst_11 = arith.constant 9.99999974E-6 : f32
    %22 = vector.broadcast %cst_11 : f32 to vector<1x8xf32>
    %23 = arith.addf %19, %22 : vector<1x8xf32>
    %24 = math.rsqrt %23 : vector<1x8xf32>
    %25 = vector.broadcast %24 : vector<1x8xf32> to vector<20x8xf32>
    %26 = arith.mulf %21, %25 : vector<20x8xf32>
    %c1 = arith.constant 1 : index
    %c0_12 = arith.constant 0 : index
    %27 = vector.load %arg3[%c1, %c0_12] : memref<8x128xf32, #tpu.memory_space<vmem>>, vector<1x8xf32>
    %28 = vector.broadcast %27 : vector<1x8xf32> to vector<20x8xf32>
    %29 = arith.mulf %26, %28 : vector<20x8xf32>
    %c2 = arith.constant 2 : index
    %c0_13 = arith.constant 0 : index
    %30 = vector.load %arg3[%c2, %c0_13] : memref<8x128xf32, #tpu.memory_space<vmem>>, vector<1x8xf32>
    %31 = vector.broadcast %30 : vector<1x8xf32> to vector<20x8xf32>
    %32 = arith.addf %29, %31 : vector<20x8xf32>
    %cst_14 = arith.constant 0.000000e+00 : f32
    %33 = vector.broadcast %cst_14 : f32 to vector<8x12xf32>
    %34 = vector.extract_strided_slice %32 {offsets = [0, 0], sizes = [8, 8], strides = [1, 1]} : vector<20x8xf32> to vector<8x8xf32>
    %c24 = arith.constant 24 : index
    %c0_15 = arith.constant 0 : index
    %35 = vector.load %arg2[%c24, %c0_15] : memref<176x128xf32, #tpu.memory_space<vmem>>, vector<8x12xf32>
    %cst_16 = arith.constant dense<0.000000e+00> : vector<8x12xf32>
    %36 = tpu.matmul %34, %35, %cst_16 {dimension_numbers = #tpu.dot_dimension_numbers<[1], [0], [0], [1], [0, 0, 1, 1], [], []>} : vector<8x8xf32>, vector<8x12xf32>, vector<8x12xf32> -> vector<8x12xf32>
    %37 = arith.addf %33, %36 : vector<8x12xf32>
    %38 = vector.extract_strided_slice %32 {offsets = [1, 0], sizes = [8, 8], strides = [1, 1]} : vector<20x8xf32> to vector<8x8xf32>
    %c32 = arith.constant 32 : index
    %c0_17 = arith.constant 0 : index
    %39 = vector.load %arg2[%c32, %c0_17] : memref<176x128xf32, #tpu.memory_space<vmem>>, vector<8x12xf32>
    %cst_18 = arith.constant dense<0.000000e+00> : vector<8x12xf32>
    %40 = tpu.matmul %38, %39, %cst_18 {dimension_numbers = #tpu.dot_dimension_numbers<[1], [0], [0], [1], [0, 0, 1, 1], [], []>} : vector<8x8xf32>, vector<8x12xf32>, vector<8x12xf32> -> vector<8x12xf32>
    %41 = arith.addf %37, %40 : vector<8x12xf32>
    %42 = vector.extract_strided_slice %32 {offsets = [2, 0], sizes = [8, 8], strides = [1, 1]} : vector<20x8xf32> to vector<8x8xf32>
    %c40 = arith.constant 40 : index
    %c0_19 = arith.constant 0 : index
    %43 = vector.load %arg2[%c40, %c0_19] : memref<176x128xf32, #tpu.memory_space<vmem>>, vector<8x12xf32>
    %cst_20 = arith.constant dense<0.000000e+00> : vector<8x12xf32>
    %44 = tpu.matmul %42, %43, %cst_20 {dimension_numbers = #tpu.dot_dimension_numbers<[1], [0], [0], [1], [0, 0, 1, 1], [], []>} : vector<8x8xf32>, vector<8x12xf32>, vector<8x12xf32> -> vector<8x12xf32>
    %45 = arith.addf %41, %44 : vector<8x12xf32>
    %46 = vector.extract_strided_slice %32 {offsets = [5, 0], sizes = [8, 8], strides = [1, 1]} : vector<20x8xf32> to vector<8x8xf32>
    %c48 = arith.constant 48 : index
    %c0_21 = arith.constant 0 : index
    %47 = vector.load %arg2[%c48, %c0_21] : memref<176x128xf32, #tpu.memory_space<vmem>>, vector<8x12xf32>
    %cst_22 = arith.constant dense<0.000000e+00> : vector<8x12xf32>
    %48 = tpu.matmul %46, %47, %cst_22 {dimension_numbers = #tpu.dot_dimension_numbers<[1], [0], [0], [1], [0, 0, 1, 1], [], []>} : vector<8x8xf32>, vector<8x12xf32>, vector<8x12xf32> -> vector<8x12xf32>
    %49 = arith.addf %45, %48 : vector<8x12xf32>
    %50 = vector.extract_strided_slice %32 {offsets = [6, 0], sizes = [8, 8], strides = [1, 1]} : vector<20x8xf32> to vector<8x8xf32>
    %c56 = arith.constant 56 : index
    %c0_23 = arith.constant 0 : index
    %51 = vector.load %arg2[%c56, %c0_23] : memref<176x128xf32, #tpu.memory_space<vmem>>, vector<8x12xf32>
    %cst_24 = arith.constant dense<0.000000e+00> : vector<8x12xf32>
    %52 = tpu.matmul %50, %51, %cst_24 {dimension_numbers = #tpu.dot_dimension_numbers<[1], [0], [0], [1], [0, 0, 1, 1], [], []>} : vector<8x8xf32>, vector<8x12xf32>, vector<8x12xf32> -> vector<8x12xf32>
    %53 = arith.addf %49, %52 : vector<8x12xf32>
    %54 = vector.extract_strided_slice %32 {offsets = [7, 0], sizes = [8, 8], strides = [1, 1]} : vector<20x8xf32> to vector<8x8xf32>
    %c64 = arith.constant 64 : index
    %c0_25 = arith.constant 0 : index
    %55 = vector.load %arg2[%c64, %c0_25] : memref<176x128xf32, #tpu.memory_space<vmem>>, vector<8x12xf32>
    %cst_26 = arith.constant dense<0.000000e+00> : vector<8x12xf32>
    %56 = tpu.matmul %54, %55, %cst_26 {dimension_numbers = #tpu.dot_dimension_numbers<[1], [0], [0], [1], [0, 0, 1, 1], [], []>} : vector<8x8xf32>, vector<8x12xf32>, vector<8x12xf32> -> vector<8x12xf32>
    %57 = arith.addf %53, %56 : vector<8x12xf32>
    %58 = vector.extract_strided_slice %32 {offsets = [10, 0], sizes = [8, 8], strides = [1, 1]} : vector<20x8xf32> to vector<8x8xf32>
    %c72 = arith.constant 72 : index
    %c0_27 = arith.constant 0 : index
    %59 = vector.load %arg2[%c72, %c0_27] : memref<176x128xf32, #tpu.memory_space<vmem>>, vector<8x12xf32>
    %cst_28 = arith.constant dense<0.000000e+00> : vector<8x12xf32>
    %60 = tpu.matmul %58, %59, %cst_28 {dimension_numbers = #tpu.dot_dimension_numbers<[1], [0], [0], [1], [0, 0, 1, 1], [], []>} : vector<8x8xf32>, vector<8x12xf32>, vector<8x12xf32> -> vector<8x12xf32>
    %61 = arith.addf %57, %60 : vector<8x12xf32>
    %62 = vector.extract_strided_slice %32 {offsets = [11, 0], sizes = [8, 8], strides = [1, 1]} : vector<20x8xf32> to vector<8x8xf32>
    %c80 = arith.constant 80 : index
    %c0_29 = arith.constant 0 : index
    %63 = vector.load %arg2[%c80, %c0_29] : memref<176x128xf32, #tpu.memory_space<vmem>>, vector<8x12xf32>
    %cst_30 = arith.constant dense<0.000000e+00> : vector<8x12xf32>
    %64 = tpu.matmul %62, %63, %cst_30 {dimension_numbers = #tpu.dot_dimension_numbers<[1], [0], [0], [1], [0, 0, 1, 1], [], []>} : vector<8x8xf32>, vector<8x12xf32>, vector<8x12xf32> -> vector<8x12xf32>
    %65 = arith.addf %61, %64 : vector<8x12xf32>
    %66 = vector.extract_strided_slice %32 {offsets = [12, 0], sizes = [8, 8], strides = [1, 1]} : vector<20x8xf32> to vector<8x8xf32>
    %c88 = arith.constant 88 : index
    %c0_31 = arith.constant 0 : index
    %67 = vector.load %arg2[%c88, %c0_31] : memref<176x128xf32, #tpu.memory_space<vmem>>, vector<8x12xf32>
    %cst_32 = arith.constant dense<0.000000e+00> : vector<8x12xf32>
    %68 = tpu.matmul %66, %67, %cst_32 {dimension_numbers = #tpu.dot_dimension_numbers<[1], [0], [0], [1], [0, 0, 1, 1], [], []>} : vector<8x8xf32>, vector<8x12xf32>, vector<8x12xf32> -> vector<8x12xf32>
    %69 = arith.addf %65, %68 : vector<8x12xf32>
    %c3 = arith.constant 3 : index
    %c0_33 = arith.constant 0 : index
    %70 = vector.load %arg3[%c3, %c0_33] : memref<8x128xf32, #tpu.memory_space<vmem>>, vector<1x12xf32>
    %71 = vector.broadcast %70 : vector<1x12xf32> to vector<8x12xf32>
    %72 = arith.addf %69, %71 : vector<8x12xf32>
    %cst_34 = arith.constant 0.000000e+00 : f32
    %73 = vector.broadcast %cst_34 : f32 to vector<8x12xf32>
    %74 = arith.maximumf %72, %73 : vector<8x12xf32>
    %75 = tpu.iota {dimensions = array<i32: 0>} : vector<8x1xi32>
    %c3_i32 = arith.constant 3 : i32
    %76 = vector.broadcast %c3_i32 : i32 to vector<8x1xi32>
    %77 = arith.cmpi slt, %75, %76 : vector<8x1xi32>
    %c4_i32 = arith.constant 4 : i32
    %78 = vector.broadcast %c4_i32 : i32 to vector<8x1xi32>
    %79 = arith.cmpi sgt, %75, %78 : vector<8x1xi32>
    %80 = arith.ori %77, %79 : vector<8x1xi1>
    %cst_35 = arith.constant 0.000000e+00 : f32
    %81 = vector.shape_cast %80 : vector<8x1xi1> to vector<8x1xi1>
    %82 = vector.broadcast %81 : vector<8x1xi1> to vector<8x12xi1>
    %83 = vector.broadcast %cst_35 : f32 to vector<8x12xf32>
    %84 = arith.select %82, %74, %83 : vector<8x12xi1>, vector<8x12xf32>
    %cst_36 = arith.constant dense<0.000000e+00> : vector<12xf32>
    %85 = vector.multi_reduction <add>, %84, %cst_36 [0] : vector<8x12xf32> to vector<12xf32>
    %86 = vector.shape_cast %85 : vector<12xf32> to vector<1x12xf32>
    %cst_37 = arith.constant 6.000000e+00 : f32
    %87 = vector.broadcast %cst_37 : f32 to vector<1x12xf32>
    %88 = arith.divf %86, %87 : vector<1x12xf32>
    %89 = vector.broadcast %88 : vector<1x12xf32> to vector<8x12xf32>
    %90 = arith.subf %74, %89 : vector<8x12xf32>
    %cst_38 = arith.constant 0.000000e+00 : f32
    %91 = vector.shape_cast %80 : vector<8x1xi1> to vector<8x1xi1>
    %92 = vector.broadcast %91 : vector<8x1xi1> to vector<8x12xi1>
    %93 = vector.broadcast %cst_38 : f32 to vector<8x12xf32>
    %94 = arith.select %92, %90, %93 : vector<8x12xi1>, vector<8x12xf32>
    %95 = arith.mulf %94, %94 : vector<8x12xf32>
    %cst_39 = arith.constant dense<0.000000e+00> : vector<12xf32>
    %96 = vector.multi_reduction <add>, %95, %cst_39 [0] : vector<8x12xf32> to vector<12xf32>
    %97 = vector.shape_cast %96 : vector<12xf32> to vector<1x12xf32>
    %cst_40 = arith.constant 6.000000e+00 : f32
    %98 = vector.broadcast %cst_40 : f32 to vector<1x12xf32>
    %99 = arith.divf %97, %98 : vector<1x12xf32>
    %100 = vector.broadcast %88 : vector<1x12xf32> to vector<8x12xf32>
    %101 = arith.subf %74, %100 : vector<8x12xf32>
    %cst_41 = arith.constant 9.99999974E-6 : f32
    %102 = vector.broadcast %cst_41 : f32 to vector<1x12xf32>
    %103 = arith.addf %99, %102 : vector<1x12xf32>
    %104 = math.rsqrt %103 : vector<1x12xf32>
    %105 = vector.broadcast %104 : vector<1x12xf32> to vector<8x12xf32>
    %106 = arith.mulf %101, %105 : vector<8x12xf32>
    %c4 = arith.constant 4 : index
    %c0_42 = arith.constant 0 : index
    %107 = vector.load %arg3[%c4, %c0_42] : memref<8x128xf32, #tpu.memory_space<vmem>>, vector<1x12xf32>
    %108 = vector.broadcast %107 : vector<1x12xf32> to vector<8x12xf32>
    %109 = arith.mulf %106, %108 : vector<8x12xf32>
    %c5 = arith.constant 5 : index
    %c0_43 = arith.constant 0 : index
    %110 = vector.load %arg3[%c5, %c0_43] : memref<8x128xf32, #tpu.memory_space<vmem>>, vector<1x12xf32>
    %111 = vector.broadcast %110 : vector<1x12xf32> to vector<8x12xf32>
    %112 = arith.addf %109, %111 : vector<8x12xf32>
    %113 = vector.extract_strided_slice %112 {offsets = [0, 0], sizes = [1, 12], strides = [1, 1]} : vector<8x12xf32> to vector<1x12xf32>
    %114 = vector.extract_strided_slice %112 {offsets = [1, 0], sizes = [1, 12], strides = [1, 1]} : vector<8x12xf32> to vector<1x12xf32>
    %115 = arith.maximumf %113, %114 : vector<1x12xf32>
    %116 = vector.extract_strided_slice %112 {offsets = [5, 0], sizes = [1, 12], strides = [1, 1]} : vector<8x12xf32> to vector<1x12xf32>
    %117 = vector.extract_strided_slice %112 {offsets = [6, 0], sizes = [1, 12], strides = [1, 1]} : vector<8x12xf32> to vector<1x12xf32>
    %118 = arith.maximumf %116, %117 : vector<1x12xf32>
    %119 = arith.maximumf %115, %118 : vector<1x12xf32>
    %c96 = arith.constant 96 : index
    %c0_44 = arith.constant 0 : index
    %120 = vector.load %arg2[%c96, %c0_44] : memref<176x128xf32, #tpu.memory_space<vmem>>, vector<12x64xf32>
    %cst_45 = arith.constant dense<0.000000e+00> : vector<1x64xf32>
    %121 = tpu.matmul %119, %120, %cst_45 {dimension_numbers = #tpu.dot_dimension_numbers<[1], [0], [0], [1], [0, 0, 1, 1], [], []>} : vector<1x12xf32>, vector<12x64xf32>, vector<1x64xf32> -> vector<1x64xf32>
    %c6 = arith.constant 6 : index
    %c0_46 = arith.constant 0 : index
    %122 = vector.load %arg3[%c6, %c0_46] : memref<8x128xf32, #tpu.memory_space<vmem>>, vector<1x64xf32>
    %123 = arith.addf %121, %122 : vector<1x64xf32>
    %cst_47 = arith.constant 0.000000e+00 : f32
    %124 = vector.broadcast %cst_47 : f32 to vector<1x64xf32>
    %125 = arith.maximumf %123, %124 : vector<1x64xf32>
    %c112 = arith.constant 112 : index
    %c0_48 = arith.constant 0 : index
    %126 = vector.load %arg2[%c112, %c0_48] : memref<176x128xf32, #tpu.memory_space<vmem>>, vector<64x8xf32>
    %cst_49 = arith.constant dense<0.000000e+00> : vector<1x8xf32>
    %127 = tpu.matmul %125, %126, %cst_49 {dimension_numbers = #tpu.dot_dimension_numbers<[1], [0], [0], [1], [0, 0, 1, 1], [], []>} : vector<1x64xf32>, vector<64x8xf32>, vector<1x8xf32> -> vector<1x8xf32>
    %c7 = arith.constant 7 : index
    %c0_50 = arith.constant 0 : index
    %128 = vector.load %arg3[%c7, %c0_50] : memref<8x128xf32, #tpu.memory_space<vmem>>, vector<1x8xf32>
    %129 = arith.addf %127, %128 : vector<1x8xf32>
    %130 = tpu.iota {dimensions = array<i32: 1>} : vector<1x8xi32>
    %c7_i32 = arith.constant 7 : i32
    %131 = vector.broadcast %c7_i32 : i32 to vector<1x8xi32>
    %132 = arith.cmpi slt, %130, %131 : vector<1x8xi32>
    %cst_51 = arith.constant -1.000000e+30 : f32
    %133 = vector.broadcast %cst_51 : f32 to vector<1x8xf32>
    %134 = arith.select %132, %129, %133 : vector<1x8xi1>, vector<1x8xf32>
    %cst_52 = arith.constant dense<0xFF800000> : vector<1xf32>
    %135 = vector.multi_reduction <maximumf>, %134, %cst_52 [1] : vector<1x8xf32> to vector<1xf32>
    %136 = vector.shape_cast %135 : vector<1xf32> to vector<1x1xf32>
    %137 = vector.broadcast %136 : vector<1x1xf32> to vector<1x8xf32>
    %138 = arith.subf %134, %137 : vector<1x8xf32>
    %139 = math.exp %138 : vector<1x8xf32>
    %cst_53 = arith.constant dense<0.000000e+00> : vector<1xf32>
    %140 = vector.multi_reduction <add>, %139, %cst_53 [1] : vector<1x8xf32> to vector<1xf32>
    %141 = vector.shape_cast %140 : vector<1xf32> to vector<1x1xf32>
    %142 = vector.broadcast %141 : vector<1x1xf32> to vector<1x8xf32>
    %143 = arith.divf %139, %142 : vector<1x8xf32>
    %144 = arith.select %132, %143, %129 : vector<1x8xi1>, vector<1x8xf32>
    %145 = vector.shape_cast %144 : vector<1x8xf32> to vector<1x1x8xf32>
    %c0_54 = arith.constant 0 : index
    %c0_55 = arith.constant 0 : index
    %c0_56 = arith.constant 0 : index
    %146 = vector.load %arg4[%c0_54, %c0_55, %c0_56] : memref<1x1x8xf32, #tpu.memory_space<vmem>>, vector<1x1x8xf32>
    tpu.vector_store %arg4[%c0_54, %c0_55, %c0_56], %145 {strides = array<i32>} : memref<1x1x8xf32, #tpu.memory_space<vmem>>, vector<1x1x8xf32>,
    return
  }
  func.func @transform_0(%arg0: i32) -> (i32, i32, i32) {
    %c0_i32 = arith.constant 0 : i32
    %c0_i32_0 = arith.constant 0 : i32
    %c0_i32_1 = arith.constant 0 : i32
    return %arg0, %c0_i32, %c0_i32_0 : i32, i32, i32
  }
  func.func @transform_1(%arg0: i32) -> (i32, i32) {
    %c0_i32 = arith.constant 0 : i32
    %c0_i32_0 = arith.constant 0 : i32
    %c0_i32_1 = arith.constant 0 : i32
    return %c0_i32, %c0_i32_0 : i32, i32
  }
  func.func @transform_2(%arg0: i32) -> (i32, i32) {
    %c0_i32 = arith.constant 0 : i32
    %c0_i32_0 = arith.constant 0 : i32
    %c0_i32_1 = arith.constant 0 : i32
    return %c0_i32, %c0_i32_0 : i32, i32
  }
  func.func @transform_3(%arg0: i32) -> (i32, i32, i32) {
    %c0_i32 = arith.constant 0 : i32
    %c0_i32_0 = arith.constant 0 : i32
    %c0_i32_1 = arith.constant 0 : i32
    return %arg0, %c0_i32, %c0_i32_0 : i32, i32, i32
  }
}

</mosaic_0001>

<bundles_post_ra>
// kernel: actor_critic_forward.1
= control target key start
LH: loop header
LB: loop body
LE: loop exit
PB: predicated region body
PF: predicated region fallthrough
CT: control target
= control target key end

     0   :  { %s816_s12 = smov 0   ;;  %s966_s0 = inlined_call_operand.vmem [shape: f32[4,20,18], index: 0, kind: input, shape index: {}]   ;;  %s967_s1 = inlined_call_operand.vmem [shape: f32[176,128], index: 1, kind: input, shape index: {}]   ;;  %s968_s2 = inlined_call_operand.vmem [shape: f32[8,128], index: 2, kind: input, shape index: {}]   ;;  %s969_s3 = inlined_call_operand.vmem [shape: f32[4,1,8], index: 3, kind: output, shape index: {}]  }
   0x1 LB: > { %s733_s13 = sadd.s32 4294967295, %s792_s12   ;;  %p737_p0 = scmp.ge.s32.totalorder %s792_s12, 1  ;;  %s792_s12 = sphi %s816_s12, %s13_s12  }
   0x2   : > { %p137_p1 = scmp.lt.s32.totalorder %s792_s12, 5 }
   0x4   : > { %p138_p2 = pnand %p737_p0, %p137_p1 }
   0x5   : > { %p159_p3 = scmp.lt.s32.totalorder (!%p138_p2), %s733_s13, 3 }
   0x6   : > { %141 = sbr.rel (%p138_p2) target bundleno = 981 (0x3d5), region = 32 }
   0xb   : > { %v172_v0 = vld [vmem:[%s967_s1 + $0x10] sm:$0x3]  ;;  %vm185_vm0 = vcmask 1041408   ;;  %v171_v1 = vld [vmem:[%s967_s1 + $0x8] sm:$0xff]  ;;  %v170_v2 = vld [vmem:[%s967_s1] sm:$0xff]  ;;  %s973_s13 = smov (!%p159_p3, %s733_s13), 3 }
   0xc   : > { %739 = vmatpush.msk.msra.mxu0 %vm185_vm0, %v172_v0  ;;  %s757_s20 = smul.u32 24, %s973_s13  ;;  %vm175_vm1 = vcmask 146432   ;;  %v768_v7 = vld [vmem:[%s968_s2] ss:$0 sm:$0xff]  ;;  %v794_v9 = vmov 20.0   ;;  %vm218_vm2 = vcmask 64512   ;;  %s166_s30 = scalar_lea.vmem %s969_s3, %s973_s13 }
   0xd   : > { %774 = vrcp.f32 %v794_v9  ;;  %vm222_vm3 = vcmask 60416   ;;  %v281_v50 = vld [vmem:[%s967_s1 + $0x18] sm:$0xff]  ;;  %v282_v53 = vld [vmem:[%s967_s1 + $0x20] sm:$0xff]  ;;  %v333_v54 = vld [vmem:[%s967_s1 + $0x28] sm:$0xff]  ;;  %vm285_vm8 = vcmask 1046528   ;;  %vm334_vm9 = vcmask 1045504  }
   0xe   : > { %203 = vmatpush.msra.mxu0 %v171_v1  ;;  %s163_s23 = scalar_lea.vmem %s966_s0, %s757_s20  ;;  %328 = vmatpush.msra.mxu2 %v281_v50  ;;  %v389_v52 = vld [vmem:[%s967_s1 + $0x38] sm:$0xff]  ;;  %v416_v56 = vld [vmem:[%s967_s1 + $0x40] sm:$0xff]  ;;  %v361_v57 = vld [vmem:[%s967_s1 + $0x30] sm:$0xff]  ;;  %vm362_vm10 = vcmask 1042432   ;;  %vm417_vm11 = vcmask 1040384   ;;  %vm472_vm12 = vcmask 1044480  }
   0xf   : > { %v167_v3 = vld [vmem:[%s163_s23] sm:$0xff]  ;;  %v168_v4 = vld [vmem:[%s163_s23 + $0x8] sm:$0xff]  ;;  %v169_v5 = vld [vmem:[%s163_s23 + $0x10] sm:$0xf]  ;;  %306 = vmatpush.msra.mxu1 %v282_v53  ;;  %355 = vmatpush.msra.mxu3 %v333_v54  ;;  %vm500_vm13 = vcmask 1043456  }
  0x10   : > { %204 = vmatpush.msra.mxu0 %v170_v2  ;;  %410 = vmatpush.msrb.mxu2 %v389_v52  ;;  %v769_v2 = vld [vmem:[%s968_s2 + $0x1] ss:$0 sm:$0xff]  ;;  %v795_v52 = vmov 6.0  }
  0x11   : > { %740 = vmatmul.msk.f32.vlgmr.msra.gmra.mxu0 %vm175_vm1, %v167_v3  ;;  %438 = vmatpush.msrb.mxu3 %v416_v56 }
  0x12   : > { %383 = vmatpush.msrb.mxu1 %v361_v57 }
  0x13   : > { %v775_v13 = vpop.eup %774 }
  0x14   : > { %v232_v18 = vmul.f32 20.0, %v775_v13  ;;  %vm236_vm4 = vweird.f32 %v775_v13 }
  0x16   : > { %v233_v23 = vsub.f32 1.0, %v232_v18  ;;  %v444_v18 = vld [vmem:[%s967_s1 + $0x48] sm:$0xff] }
  0x18   : > { %v234_v26 = vmul.f32 %v775_v13, %v233_v23 }
  0x19   : > { %741 = vmatmul.msk.f32.gmra.mxu0 %vm175_vm1, %v168_v4 }
  0x1a   : > { %v235_v29 = vadd.f32 %v775_v13, %v234_v26 }
  0x1c   : > { %v237_v32 = vsel %vm236_vm4, %v775_v13, %v235_v29 }
  0x21   : > { %742 = vmatmul.msk.f32.gmra.mxu0 %vm175_vm1, %v169_v5  ;;  %vm539_vm1 = vcmask 97280  }
  0x8e   : > { %v206_v6 = vpop.f32.mrf.mxu0 }
  0x8f   : > { %v207_v11 = vadd.f32 %v768_v7, %v206_v6  ;;  %v770_v6 = vld [vmem:[%s968_s2 + $0x2] ss:$0 sm:$0xff] }
  0x91   : > { %v215_v14 = vmax.f32 %v207_v11, 0.0  ;;  %v471_v11 = vld [vmem:[%s967_s1 + $0x50] sm:$0xff] }
  0x93   : > { %v219_v19 = vsel %vm218_vm2, %v215_v14, 0.0 }
  0x96   : > { %v209_v8 = vpop.f32.mrf.mxu0 }
  0x97   : > { %v210_v10 = vadd.f32 %v768_v7, %v209_v8 }
  0x99   : > { %v216_v12 = vmax.f32 %v210_v10, 0.0 }
  0x9b   : > { %v220_v16 = vsel %vm218_vm2, %v216_v12, 0.0 }
  0x9c   : > { %v221_v21 = vadd.f32 %v220_v16, %v219_v19 }
  0x9e   : > { %v212_v15 = vpop.f32.mrf.mxu0 }
  0x9f   : > { %v213_v17 = vadd.f32 %v768_v7, %v212_v15 }
  0xa1   : > { %v217_v20 = vmax.f32 %v213_v17, 0.0  ;;  %v499_v17 = vld [vmem:[%s967_s1 + $0x58] sm:$0xff] }
  0xa3   : > { %v223_v22 = vsel %vm222_vm3, %v217_v20, 0.0 }
  0xa4   : > { %v224_v24 = vadd.f32 %v223_v22, %v221_v21 }
  0xa6   : > { %v225_v25 = vrot.slane %v224_v24, 4 }
  0xa8   : > { %v226_v27 = vadd.f32 %v225_v25, %v224_v24 }
  0xaa   : > { %v227_v28 = vrot.slane %v226_v27, 2 }
  0xac   : > { %v228_v30 = vadd.f32 %v227_v28, %v226_v27 }
  0xae   : > { %v229_v31 = vrot.slane %v228_v30, 1 }
  0xb0   : > { %v230_v33 = vadd.f32 %v229_v31, %v228_v30 }
  0xb2   : > { %v238_v34 = vmul.f32 %v237_v32, %v230_v33 }
  0xb4   : > { %v239_v35 = vsub.f32 %v215_v14, %v238_v34  ;;  %v240_v36 = vsub.f32 %v216_v12, %v238_v34  ;;  %v241_v37 = vsub.f32 %v217_v20, %v238_v34 }
  0xb6   : > { %v242_v38 = vmul.f32 %v239_v35, %v239_v35  ;;  %v243_v39 = vmul.f32 %v240_v36, %v240_v36  ;;  %v244_v40 = vmul.f32 %v241_v37, %v241_v37 }
  0xb8   : > { %v245_v41 = vsel %vm218_vm2, %v242_v38, 0.0  ;;  %v246_v42 = vsel %vm218_vm2, %v243_v39, 0.0  ;;  %v248_v44 = vsel %vm222_vm3, %v244_v40, 0.0 }
  0xb9   : > { %v247_v43 = vadd.f32 %v246_v42, %v245_v41 }
  0xbb   : > { %v249_v45 = vadd.f32 %v248_v44, %v247_v43 }
  0xbd   : > { %v250_v46 = vrot.slane %v249_v45, 4 }
  0xbf   : > { %v251_v47 = vadd.f32 %v250_v46, %v249_v45 }
  0xc1   : > { %v252_v48 = vrot.slane %v251_v47, 2 }
  0xc3   : > { %v253_v49 = vadd.f32 %v252_v48, %v251_v47 }
  0xc5   : > { %v254_v51 = vrot.slane %v253_v49, 1 }
  0xc7   : > { %v255_v55 = vadd.f32 %v254_v51, %v253_v49  ;;  %v531_v51 = vlaneseq }
  0xc9   : > { %v256_v58 = vmul.f32 %v255_v55, %v237_v32  ;;  %v532_v56 = vshrl.u32 %v531_v51, 7 }
  0xcb   : > { %v257_v59 = vadd.f32 1e-05, %v256_v58  ;;  %vm533_vm14 = vcmp.lt.s32.totalorder %v532_v56, 3  ;;  %vm534_vm15 = vcmp.gt.s32.totalorder %v532_v56, 4 }
  0xcd   : > { %776 = vrsqrt.f32 %v257_v59  ;;  %vm264_vm6 = vweird.f32 %v257_v59 }
  0xce   : > { %778 = vrcp.f32 %v795_v52 }
  0xd3   : > { %v777_v60 = vpop.eup %776 }
  0xd4   : > { %v259_v61 = vmul.f32 %v777_v60, %v257_v59  ;;  %vm265_vm5 = vweird.f32 %v777_v60  ;;  %v779_v58 = vpop.eup %778  ;;  %v771_v59 = vld [vmem:[%s968_s2 + $0x3] ss:$0 sm:$0xff] }
  0xd5   : > { %vm266_vm7 = vmor %vm264_vm6, %vm265_vm5  ;;  %vm631_vm6 = vcmask 523264  }
  0xd6   : > { %v260_v62 = vmul.f32 %v777_v60, %v259_v61 }
  0xd8   : > { %v261_v63 = vmul.f32 0.5, %v260_v62  ;;  %v548_v62 = vmul.f32 6.0, %v779_v58 }
  0xda   : > { %v262_v0 = vsub.f32 1.5, %v261_v63 }
  0xdc   : > { %v263_v1 = vmul.f32 %v777_v60, %v262_v0 }
  0xde   : > { %v267_v3 = vsel %vm266_vm7, %v777_v60, %v263_v1 }
  0xdf   : > { %v268_v4 = vmul.f32 %v267_v3, %v239_v35  ;;  %v269_v5 = vmul.f32 %v267_v3, %v240_v36  ;;  %v270_v12 = vmul.f32 %v267_v3, %v241_v37 }
  0xe1   : > { %v273_v7 = vmul.f32 %v769_v2, %v268_v4  ;;  %v274_v8 = vmul.f32 %v769_v2, %v269_v5  ;;  %v275_v21 = vmul.f32 %v769_v2, %v270_v12  ;;  %v549_v2 = vsub.f32 1.0, %v548_v62 }
  0xe3   : > { %v278_v9 = vadd.f32 %v770_v6, %v273_v7  ;;  %v279_v10 = vadd.f32 %v770_v6, %v274_v8  ;;  %v280_v28 = vadd.f32 %v770_v6, %v275_v21  ;;  %v550_v6 = vmul.f32 %v779_v58, %v549_v2 }
  0xe5   : > { %744 = vmatmul.msk.f32.vlgmr.msra.gmra.mxu2 %vm218_vm2, %v278_v9  ;;  %v286_v13 = vrot.slane %v278_v9, 1  ;;  %v287_v14 = vrot.slane %v279_v10, 1  ;;  %v335_v15 = vrot.slane %v278_v9, 2  ;;  %v336_v16 = vrot.slane %v279_v10, 2 }
  0xe6   : > { %493 = vmatpush.msra.mxu2 %v471_v11  ;;  %v390_v22 = vrot.slane %v278_v9, 6  ;;  %v391_v23 = vrot.slane %v279_v10, 6  ;;  %v363_v24 = vrot.slane %v278_v9, 5  ;;  %v364_v25 = vrot.slane %v279_v10, 5 }
  0xe7   : > { %v288_v19 = vsel %vm285_vm8, %v286_v13, %v287_v14  ;;  %v337_v20 = vsel %vm334_vm9, %v335_v15, %v336_v16  ;;  %v418_v26 = vrot.slane %v278_v9, 7  ;;  %v419_v27 = vrot.slane %v279_v10, 7 }
  0xe8   : > { %743 = vmatmul.msk.f32.vlgmr.msra.gmra.mxu1 %vm218_vm2, %v288_v19  ;;  %745 = vmatmul.msk.f32.vlgmr.msra.gmra.mxu3 %vm218_vm2, %v337_v20  ;;  %v392_v29 = vsel %vm185_vm0, %v390_v22, %v391_v23  ;;  %v365_v30 = vsel %vm362_vm10, %v363_v24, %v364_v25  ;;  %v473_v32 = vrot.slane %v279_v10, 3  ;;  %v474_v33 = vrot.slane %v280_v28, 3  ;;  %vm899_vm0 = vmor %vm533_vm14, %vm534_vm15  ;;  %v593_v25 = vld [vmem:[%s967_s1 + $0x68] sm:$0xf] }
  0xe9   : > { %521 = vmatpush.msra.mxu3 %v499_v17  ;;  %465 = vmatpush.msra.mxu1 %v444_v18  ;;  %v420_v31 = vsel %vm417_vm11, %v418_v26, %v419_v27  ;;  %v446_v34 = vrot.slane %v280_v28, 2  ;;  %v501_v35 = vrot.slane %v279_v10, 4  ;;  %v502_v36 = vrot.slane %v280_v28, 4  ;;  %v592_v26 = vld [vmem:[%s967_s1 + $0x60] sm:$0xff] }
  0xea   : > { %v475_v37 = vsel %vm472_vm12, %v473_v32, %v474_v33  ;;  %v551_v9 = vadd.f32 %v779_v58, %v550_v6  ;;  %v626_v32 = vld [vmem:[%s967_s1 + $0x90] sm:$0xff]  ;;  %vm659_vm8 = vcmask 57344  }
  0xeb   : > { %v447_v38 = vsel %vm334_vm9, %v336_v16, %v446_v34  ;;  %v503_v39 = vsel %vm500_vm13, %v501_v35, %v502_v36  ;;  %v625_v34 = vld [vmem:[%s967_s1 + $0x88] sm:$0xff]  ;;  %v624_v36 = vld [vmem:[%s967_s1 + $0x80] sm:$0xff] }
  0xed   : > { %747 = vmatmul.msk.f32.vlgmr.msrb.gmra.mxu2 %vm218_vm2, %v392_v29  ;;  %v629_v29 = vld [vmem:[%s967_s1 + $0xa8] sm:$0xff] }
  0xee   : > { %643 = vmatpush.msrb.mxu0 %v629_v29 }
  0xf0   : > { %746 = vmatmul.msk.f32.vlgmr.msrb.gmra.mxu1 %vm218_vm2, %v365_v30  ;;  %748 = vmatmul.msk.f32.vlgmr.msrb.gmra.mxu3 %vm218_vm2, %v420_v31  ;;  %v628_v30 = vld [vmem:[%s967_s1 + $0xa0] sm:$0xff]  ;;  %v627_v31 = vld [vmem:[%s967_s1 + $0x98] sm:$0xff] }
  0xf1   : > { %752 = vmatpush.msk.msrb.mxu1 %vm500_vm13, %v593_v25  ;;  %644 = vmatpush.msrb.mxu0 %v628_v30 }
  0xf3   : > { %616 = vmatpush.msrb.mxu1 %v592_v26  ;;  %645 = vmatpush.msrb.mxu0 %v627_v31 }
  0xf5   : > { %750 = vmatmul.msk.f32.vlgmr.msra.gmra.mxu2 %vm218_vm2, %v475_v37  ;;  %646 = vmatpush.msrb.mxu0 %v626_v32 }
  0xf7   : > { %647 = vmatpush.msrb.mxu0 %v625_v34 }
  0xf8   : > { %749 = vmatmul.msk.f32.vlgmr.msra.gmra.mxu1 %vm218_vm2, %v447_v38  ;;  %751 = vmatmul.msk.f32.vlgmr.msra.gmra.mxu3 %vm218_vm2, %v503_v39  ;;  %vm552_vm2 = vweird.f32 %v779_v58  ;;  %v623_v38 = vld [vmem:[%s967_s1 + $0x78] sm:$0xff] }
  0xf9   : > { %v553_v12 = vsel %vm552_vm2, %v779_v58, %v551_v9  ;;  %648 = vmatpush.msrb.mxu0 %v624_v36  ;;  %v656_v58 = vand.u32 127, %v531_v51 }
  0xfb   : > { %649 = vmatpush.msrb.mxu0 %v623_v38  ;;  %vm657_vm7 = vcmp.lt.s32.totalorder %v656_v58, 7 }
 0x165   : > { %v308_v40 = vpop.f32.mrf.mxu1 }
 0x168   : > { %v330_v41 = vpop.f32.mrf.mxu2 }
 0x169   : > { %v331_v42 = vadd.f32 %v330_v41, %v308_v40 }
 0x16b   : > { %v357_v43 = vpop.f32.mrf.mxu3 }
 0x16c   : > { %v360_v44 = vadd.f32 %v357_v43, %v331_v42  ;;  %v772_v42 = vld [vmem:[%s968_s2 + $0x4] ss:$0 sm:$0xff] }
 0x16d   : > { %v385_v45 = vpop.f32.mrf.mxu1 }
 0x16e   : > { %v388_v46 = vadd.f32 %v385_v45, %v360_v44  ;;  %v773_v45 = vld [vmem:[%s968_s2 + $0x5] ss:$0 sm:$0xff] }
 0x170   : > { %v412_v47 = vpop.f32.mrf.mxu2 }
 0x171   : > { %v415_v48 = vadd.f32 %v412_v47, %v388_v46 }
 0x173   : > { %v440_v49 = vpop.f32.mrf.mxu3 }
 0x174   : > { %v443_v50 = vadd.f32 %v440_v49, %v415_v48 }
 0x175   : > { %v467_v53 = vpop.f32.mrf.mxu1 }
 0x176   : > { %v470_v54 = vadd.f32 %v467_v53, %v443_v50  ;;  %v622_v53 = vld [vmem:[%s967_s1 + $0x70] sm:$0xff] }
 0x177   : > { %650 = vmatpush.msrb.mxu0 %v622_v53 }
 0x178   : > { %v495_v55 = vpop.f32.mrf.mxu2 }
 0x179   : > { %v498_v57 = vadd.f32 %v495_v55, %v470_v54  ;;  %v594_v54 = vld [vmem:[%s968_s2 + $0x6] sm:$0x1] }
 0x17b   : > { %v523_v60 = vpop.f32.mrf.mxu3 }
 0x17c   : > { %v526_v61 = vadd.f32 %v523_v60, %v498_v57 }
 0x17e   : > { %v529_v63 = vadd.f32 %v771_v59, %v526_v61  ;;  %v630_v59 = vld [vmem:[%s968_s2 + $0x7] sm:$0x1] }
 0x180   : > { %v530_v1 = vmax.f32 %v529_v63, 0.0 }
 0x182   : > { %v538_v3 = vsel %vm899_vm0, %v530_v1, 0.0 }
 0x183   : > { %v540_v4 = vsel %vm539_vm1, %v538_v3, 0.0 }
 0x184   : > { %v541_v5 = vrot.slane %v540_v4, 4 }
 0x186   : > { %v542_v7 = vadd.f32 %v541_v5, %v540_v4 }
 0x188   : > { %v543_v8 = vrot.slane %v542_v7, 2 }
 0x18a   : > { %v544_v10 = vadd.f32 %v543_v8, %v542_v7 }
 0x18c   : > { %v545_v11 = vrot.slane %v544_v10, 1 }
 0x18e   : > { %v546_v13 = vadd.f32 %v545_v11, %v544_v10 }
 0x190   : > { %v554_v14 = vmul.f32 %v553_v12, %v546_v13 }
 0x192   : > { %v555_v15 = vsub.f32 %v530_v1, %v554_v14 }
 0x194   : > { %v556_v16 = vsel %vm899_vm0, %v555_v15, 0.0 }
 0x195   : > { %v557_v17 = vmul.f32 %v556_v16, %v556_v16 }
 0x197   : > { %v558_v18 = vsel %vm539_vm1, %v557_v17, 0.0 }
 0x198   : > { %v559_v19 = vrot.slane %v558_v18, 4 }
 0x19a   : > { %v560_v20 = vadd.f32 %v559_v19, %v558_v18 }
 0x19c   : > { %v561_v21 = vrot.slane %v560_v20, 2 }
 0x19e   : > { %v562_v22 = vadd.f32 %v561_v21, %v560_v20 }
 0x1a0   : > { %v563_v23 = vrot.slane %v562_v22, 1 }
 0x1a2   : > { %v564_v24 = vadd.f32 %v563_v23, %v562_v22 }
 0x1a4   : > { %v565_v27 = vmul.f32 %v564_v24, %v553_v12 }
 0x1a6   : > { %v566_v28 = vadd.f32 1e-05, %v565_v27 }
 0x1a8   : > { %780 = vrsqrt.f32 %v566_v28  ;;  %vm573_vm4 = vweird.f32 %v566_v28 }
 0x1ae   : > { %v781_v33 = vpop.eup %780 }
 0x1af   : > { %v568_v35 = vmul.f32 %v781_v33, %v566_v28  ;;  %vm574_vm3 = vweird.f32 %v781_v33 }
 0x1b0   : > { %vm575_vm5 = vmor %vm573_vm4, %vm574_vm3 }
 0x1b1   : > { %v569_v37 = vmul.f32 %v781_v33, %v568_v35 }
 0x1b3   : > { %v570_v39 = vmul.f32 0.5, %v569_v37 }
 0x1b5   : > { %v571_v40 = vsub.f32 1.5, %v570_v39 }
 0x1b7   : > { %v572_v41 = vmul.f32 %v781_v33, %v571_v40 }
 0x1b9   : > { %v576_v43 = vsel %vm575_vm5, %v781_v33, %v572_v41 }
 0x1ba   : > { %v577_v44 = vmul.f32 %v576_v43, %v555_v15 }
 0x1bc   : > { %v580_v46 = vmul.f32 %v772_v42, %v577_v44 }
 0x1be   : > { %v583_v47 = vadd.f32 %v773_v45, %v580_v46 }
 0x1c0   : > { %v585_v48 = vrot.slane %v583_v47, 1 }
 0x1c2   : > { %v587_v49 = vmax.f32 %v583_v47, %v585_v48 }
 0x1c4   : > { %v589_v50 = vrot.slane %v587_v49, 5 }
 0x1c6   : > { %v591_v52 = vmax.f32 %v587_v49, %v589_v50 }
 0x1c8   : > { %753 = vmatmul.msk.f32.vlgmr.msrb.gmra.mxu1 %vm539_vm1, %v591_v52 }
 0x245   : > { %v618_v55 = vpop.f32.mrf.mxu1 }
 0x246   : > { %v619_v56 = vadd.f32 %v618_v55, %v594_v54 }
 0x248   : > { %v621_v57 = vmax.f32 %v619_v56, 0.0 }
 0x24a   : > { %754 = vmatmul.msk.f32.vlgmr.msrb.gmra.mxu0 %vm631_vm6, %v621_v57 }
 0x2c7   : > { %v652_v60 = vpop.f32.mrf.mxu0 }
 0x2c8   : > { %v653_v61 = vadd.f32 %v652_v60, %v630_v59 }
 0x2ca   : > { %v658_v62 = vsel %vm657_vm7, %v653_v61, -1e+30 }
 0x2cb   : > { %v660_v63 = vsel %vm659_vm8, %v658_v62, -inf }
 0x2cc   : > { %661 = vmax.xlane.f32.xlu0 %v660_v63 }
 0x33f   : > { %v662_v0 = vpop.xlane.xlu0 %661 }
 0x340   : > { %v663_v1 = vsub.f32 %v658_v62, %v662_v0 }
 0x342   : > { %v664_v2 = vmul.f32 1.442695, %v663_v1 }
 0x344   : > { %782 = vpow2.f32 %v664_v2 }
 0x34a   : > { %v783_v3 = vpop.eup %782 }
 0x34b   : > { %v666_v51 = vsel %vm659_vm8, %v783_v3, 0.0 }
 0x34c   : > { %667 = vadd.xlane.f32.xlu0 %v666_v51 }
 0x3bf   : > { %v668_v4 = vpop.xlane.xlu0 %667 }
 0x3c0   : > { %784 = vrcp.f32 %v668_v4  ;;  %v680_v8 = vand.u32 2147483648, %v668_v4  ;;  %v678_v10 = vand.u32 2147483647, %v668_v4  ;;  %vm674_vm10 = vweird.f32 %v668_v4 }
 0x3c2   : > { %v681_v12 = vor.u32 1.1754944e-38, %v680_v8  ;;  %vm679_vm12 = vcmp.eq.f32.partialorder %v678_v10, 8.507059e+37 }
 0x3c6   : > { %v785_v5 = vpop.eup %784 }
 0x3c7   : > { %v670_v6 = vmul.f32 %v785_v5, %v668_v4  ;;  %vm675_vm9 = vweird.f32 %v785_v5 }
 0x3c8   : > { %vm676_vm11 = vmor %vm674_vm10, %vm675_vm9 }
 0x3c9   : > { %v671_v7 = vsub.f32 1.0, %v670_v6 }
 0x3cb   : > { %v672_v9 = vmul.f32 %v785_v5, %v671_v7 }
 0x3cd   : > { %v673_v11 = vadd.f32 %v785_v5, %v672_v9 }
 0x3cf   : > { %v677_v13 = vsel %vm676_vm11, %v785_v5, %v673_v11 }
 0x3d0   : > { %v682_v14 = vsel %vm679_vm12, %v681_v12, %v677_v13 }
 0x3d1   : > { %v683_v15 = vmul.f32 %v783_v3, %v682_v14 }
 0x3d3   : > { %v684_v16 = vsel %vm657_vm7, %v683_v15, %v653_v61 }
 0x3d4   : > { %685 = vst.msk [vmem:[%s166_s30] sm:$0x1] %vm659_vm8, %v684_v16 }
 0x3d5 PF: > { %s13_s12 = sadd.s32 1, %s792_s12  }
 0x3d6   : > { %p10_p4 = scmp.ge.s32.totalorder %s13_s12, 6  }
 0x3d8   :  { %12 = sbr.rel (!%p10_p4) target bundleno = 1 (0x1), region = 62 }

</bundles_post_ra>
